<compile_context>
chip_gen: v7x
topology: tpu7x:2x2x1
jax: 0.10.0
libtpu: 0.0.40
codegen_flags: <defaults>
</compile_context>

<pallas_src>
import functools

import jax
import jax.numpy as jnp
import numpy as np
from jax.experimental import pallas as pl
from jax.experimental.pallas import tpu as pltpu


# ---------------------------------------------------------------------------
# Kernel A: one launch for ALL Gaussian sampling (text-projected + vision-raw).
#
#   ms_stack  : (depth, 2*n_ctx, vis_dim)   mean rows then sigma rows per layer
#   w_stack   : (depth, vis_dim, ctx_dim)   per-layer projection weights
#   b_stack   : (depth, 1, ctx_dim)         per-layer projection bias
#   eps_text  : (depth, Lt*n_ctx, ctx_dim)  sublane-dense
#   eps_vis   : (depth, Lv*n_ctx, vis_dim)  sublane-dense
#
#   text_out[d, r*n_ctx + c] = mu_t[d, c] + eps_text[d, r*n_ctx + c] * std_t[d, c]
#   vis_out [d, r*n_ctx + c] = mu_v[d, c] + eps_vis [d, r*n_ctx + c] * std_v[d, c]
# with mu_t/std_t from the projected rows and mu_v/std_v from the raw rows.
# ---------------------------------------------------------------------------
def sample_all_kernel(ms_ref, w_ref, b_ref, eps_t_ref, eps_v_ref,
                      text_ref, vis_ref, *, n_ctx, Lt, Lv):
    ms = ms_ref[...]                                            # (depth, 2n, vis)

    # One batched MXU pass: project mean & sigma rows of every layer at once.
    proj = jax.lax.dot_general(
        ms, w_ref[...],
        dimension_numbers=(((2,), (1,)), ((0,), (0,))),
        preferred_element_type=jnp.float32) + b_ref[...]        # (depth, 2n, ctx)

    mu_t = proj[:, :n_ctx, :]                                   # (depth, n_ctx, ctx)
    std_t = jnp.exp(0.5 * proj[:, n_ctx:, :])
    mu_v = ms[:, :n_ctx, :]                                     # (depth, n_ctx, vis)
    std_v = jnp.exp(0.5 * ms[:, n_ctx:, :])

    # Static (tiny) unrolled loops over the prompt-variant axis; stores land in
    # a sublane-dense (depth, L*n_ctx, dim) output block.
    for r in range(Lt):
        rows = slice(r * n_ctx, (r + 1) * n_ctx)
        text_ref[:, rows, :] = (
            mu_t + eps_t_ref[:, rows, :] * std_t).astype(text_ref.dtype)
    for r in range(Lv):
        rows = slice(r * n_ctx, (r + 1) * n_ctx)
        vis_ref[:, rows, :] = (
            mu_v + eps_v_ref[:, rows, :] * std_v).astype(vis_ref.dtype)


def fused_sample_all(ms_stack, w_stack, b_stack, eps_text, eps_vis,
                     n_ctx, Lt, Lv):
    depth, two_n_ctx, vis_dim = ms_stack.shape
    ctx_dim = w_stack.shape[-1]
    kernel = functools.partial(sample_all_kernel, n_ctx=n_ctx, Lt=Lt, Lv=Lv)
    return pl.pallas_call(
        kernel,
        out_shape=(
            jax.ShapeDtypeStruct((depth, Lt * n_ctx, ctx_dim), jnp.float32),
            jax.ShapeDtypeStruct((depth, Lv * n_ctx, vis_dim), jnp.float32)),
        grid=(1,),
        in_specs=[
            pl.BlockSpec((depth, two_n_ctx, vis_dim), lambda i: (0, 0, 0)),
            pl.BlockSpec((depth, vis_dim, ctx_dim), lambda i: (0, 0, 0)),
            pl.BlockSpec((depth, 1, ctx_dim), lambda i: (0, 0, 0)),
            pl.BlockSpec((depth, Lt * n_ctx, ctx_dim), lambda i: (0, 0, 0)),
            pl.BlockSpec((depth, Lv * n_ctx, vis_dim), lambda i: (0, 0, 0)),
        ],
        out_specs=(
            pl.BlockSpec((depth, Lt * n_ctx, ctx_dim), lambda i: (0, 0, 0)),
            pl.BlockSpec((depth, Lv * n_ctx, vis_dim), lambda i: (0, 0, 0)),
        ),
        compiler_params=pltpu.CompilerParams(
            dimension_semantics=("arbitrary",)),
    )(ms_stack, w_stack, b_stack, eps_text, eps_vis)


# ---------------------------------------------------------------------------
# Kernel B: scatter the sampled ctx rows into the persistent prompts buffer.
#
#   prompts_buf : (N, seq, D) in HBM (ANY), aliased to the output — prefix and
#                 suffix rows were written once at init and are never touched.
#   ctx_block   : (cls_block*Lt, n_ctx, D) in VMEM — ctx pre-expanded over
#                 cls_block classes (content identical for every class block).
#
# For each class block b the kernel DMAs ctx_block into
#   prompts[b*cls_block*Lt : ..., 1 : 1+n_ctx, :]
# keeping up to n_flight copies in flight; a possible tail block uses a
# prefix slice of ctx_block.
# ---------------------------------------------------------------------------
def scatter_ctx_kernel(_prompts_in, ctxb_ref, prompts_hbm, sems, *,
                       n_cls, Lt, n_ctx, cls_block, n_flight):
    n_full = n_cls // cls_block
    tail = n_cls - n_full * cls_block

    def copy_blk(first_cls, ncls, slot):
        rows = ncls * Lt                                   # static
        dst = prompts_hbm.at[pl.ds(first_cls * Lt, rows), pl.ds(1, n_ctx), :]
        return pltpu.make_async_copy(ctxb_ref.at[pl.ds(0, rows)], dst,
                                     sems.at[slot])

    if n_full > 0:
        @pl.loop(0, n_full)
        def _(b):
            slot = b % n_flight

            @pl.when(b >= n_flight)
            def _():
                # Retire the copy that previously used this semaphore slot
                # (same shape -> same expected semaphore count).
                copy_blk((b - n_flight) * cls_block, cls_block, slot).wait()

            copy_blk(b * cls_block, cls_block, slot).start()

        # Drain the last min(n_full, n_flight) outstanding copies (static loop).
        for j in range(max(0, n_full - n_flight), n_full):
            copy_blk(j * cls_block, cls_block, j % n_flight).wait()

    if tail > 0:
        cp = copy_blk(n_full * cls_block, tail, 0)
        cp.start()
        cp.wait()


def scatter_ctx_into_prompts(prompts_buf, ctx_text, n_cls, Lt, n_ctx, *,
                             target_block_bytes=2 << 20, n_flight=4):
    """prompts_buf: (N, seq, D) persistent buffer; ctx_text: (Lt, n_ctx, D).
    Returns prompts with rows [1, 1+n_ctx) of prompt n replaced by
    ctx_text[n % Lt].  Output aliases prompts_buf (in-place when donated)."""
    N, seq, D = prompts_buf.shape
    assert N == n_cls * Lt
    assert seq >= 1 + n_ctx, "sequence must hold prefix + n_ctx ctx tokens"

    itemsize = jnp.dtype(prompts_buf.dtype).itemsize
    bytes_per_class = Lt * n_ctx * D * itemsize
    # ~2 MiB DMA blocks: big enough to amortize DMA setup on all generations,
    # small enough for v5e's 16 MiB / v7x's 32 MiB default scoped VMEM.
    cls_block = max(1, min(n_cls, target_block_bytes // max(1, bytes_per_class)))

    # Pre-expand the ctx pattern over one class block (identical for every
    # block) so the kernel does no broadcast/reshape work — just DMAs.
    ctx_block = jnp.tile(ctx_text.astype(prompts_buf.dtype), (cls_block, 1, 1))

    kernel = functools.partial(scatter_ctx_kernel, n_cls=n_cls, Lt=Lt,
                               n_ctx=n_ctx, cls_block=cls_block,
                               n_flight=n_flight)
    return pl.pallas_call(
        kernel,
        out_shape=jax.ShapeDtypeStruct((N, seq, D), prompts_buf.dtype),
        grid=(1,),
        in_specs=[
            pl.BlockSpec(memory_space=pl.ANY),                         # prompts (HBM)
            pl.BlockSpec((cls_block * Lt, n_ctx, D), lambda i: (0, 0, 0)),
        ],
        out_specs=pl.BlockSpec(memory_space=pl.ANY),
        scratch_shapes=[pltpu.SemaphoreType.DMA((n_flight,))],
        input_output_aliases={0: 0},
        compiler_params=pltpu.CompilerParams(
            dimension_semantics=("arbitrary",),
            has_side_effects=True),
    )(prompts_buf, ctx_text_expanded := ctx_block)


# ---------------------------------------------------------------------------
# Init-time helper: build the persistent prompts buffer once (frozen prefix +
# placeholder ctx rows + frozen suffix).  The ctx rows are overwritten by the
# scatter kernel every forward.
# ---------------------------------------------------------------------------
def init_prompts_buffer(token_prefix, token_suffix, n_ctx):
    N, _, D = token_prefix.shape
    ctx_placeholder = jnp.zeros((N, n_ctx, D), token_prefix.dtype)
    return jnp.concatenate([token_prefix, ctx_placeholder, token_suffix], axis=1)


# ---------------------------------------------------------------------------
# PromptLearner forward (glue in plain JAX, compute in the 2 kernels above).
# ---------------------------------------------------------------------------
def prompt_learner_forward(params, prompts_buf, rng, *, cfg):
    n_cls = cfg["n_cls"]
    n_ctx = cfg["n_ctx"]
    ctx_dim = cfg["ctx_dim"]
    vis_dim = cfg["vis_dim"]
    Lt = cfg["text_prompts_number"]
    Lv = cfg["vision_prompts_number"]
    depth = cfg["compound_prompts_depth"]

    # Two stacked RNG draws instead of 2*depth separate ones (sublane-dense).
    k_text, k_vis = jax.random.split(rng, 2)
    eps_text = jax.random.normal(k_text, (depth, Lt * n_ctx, ctx_dim), jnp.float32)
    eps_vis = jax.random.normal(k_vis, (depth, Lv * n_ctx, vis_dim), jnp.float32)

    # Stack per-layer parameters along a leading "layer" axis (layer 0 = main ctx).
    means = jnp.stack([params["ctx_mean"]] + list(params["compound_vis_mean"]))
    sigmas = jnp.stack([params["ctx_sigma"]] + list(params["compound_vis_sigma"]))
    ms_stack = jnp.concatenate([means, sigmas], axis=1)      # (depth, 2*n_ctx, vis_dim)
    w_stack = jnp.stack([params["proj_w"]] + list(params["compound_proj_w"]))
    b_stack = jnp.stack([params["proj_b"]] + list(params["compound_proj_b"]))

    # --- ONE launch: all text-projected + vision-raw samples ---
    text_flat, vis_flat = fused_sample_all(ms_stack, w_stack, b_stack,
                                           eps_text, eps_vis, n_ctx, Lt, Lv)
    text_all = text_flat.reshape(depth, Lt, n_ctx, ctx_dim)
    vis_all = vis_flat.reshape(depth, Lv, n_ctx, vis_dim)

    ctx_text = text_all[0]                                   # (Lt, n_ctx, ctx_dim)
    text_deep_prompts = [text_all[i] for i in range(1, depth)]
    shared_ctx = vis_all[0]                                  # (Lv, n_ctx, vis_dim)
    compound_prompts_vision = [vis_all[i] for i in range(1, depth)]

    # --- ONE launch: scatter only the ctx rows into the persistent buffer ---
    prompts = scatter_ctx_into_prompts(prompts_buf, ctx_text, n_cls, Lt, n_ctx)

    return prompts, shared_ctx, compound_prompts_vision, text_deep_prompts, (
        eps_text, eps_vis)


# ---------------------------------------------------------------------------
# Plain-JAX reference (for correctness checking only).
# ---------------------------------------------------------------------------
def ref_proj_sample(mean, sigma, w, b, eps):
    mu = mean @ w + b
    logvar = sigma @ w + b
    return mu[None] + eps * jnp.exp(0.5 * logvar)[None]


def ref_sample(mu, logvar, eps):
    return mu[None] + eps * jnp.exp(0.5 * logvar)[None]


if __name__ == "__main__":
    # Small, module-consistent config.  Feature dims are 128 (lane-dense);
    # real CLIP dims are vis_dim=768, ctx_dim=512, seq=77.
    cfg = dict(
        n_cls=3,                   # number of classnames
        n_ctx=4,                   # N_CTX context tokens
        vis_dim=128,               # (768 in CLIP) vision width, shrunk
        ctx_dim=128,               # (512 in CLIP) text width, shrunk
        text_prompts_number=2,     # TEXT_PROMPT_NUMBER
        vision_prompts_number=2,   # VISION_PROMPT_NUMBER
        compound_prompts_depth=3,  # TEXT_PROMPT_DEPTH -> 2 compound layers
        seq_len=16,                # (77 in CLIP) token sequence length
    )
    n_cls, n_ctx = cfg["n_cls"], cfg["n_ctx"]
    vis_dim, ctx_dim = cfg["vis_dim"], cfg["ctx_dim"]
    Lt = cfg["text_prompts_number"]
    Lv = cfg["vision_prompts_number"]
    depth = cfg["compound_prompts_depth"]
    seq_len = cfg["seq_len"]
    suffix_len = seq_len - 1 - n_ctx
    N = n_cls * Lt

    root = jax.random.PRNGKey(0)
    pkeys = jax.random.split(root, 16)

    params = {
        # nn.init.normal_(std=0.02)
        "ctx_mean": 0.02 * jax.random.normal(pkeys[0], (n_ctx, vis_dim), jnp.float32),
        # torch.ones
        "ctx_sigma": jnp.ones((n_ctx, vis_dim), jnp.float32),
        # nn.Linear(vis_dim, ctx_dim): y = x @ W + b  (W stored (in, out))
        "proj_w": 0.05 * jax.random.normal(pkeys[1], (vis_dim, ctx_dim), jnp.float32),
        "proj_b": 0.01 * jax.random.normal(pkeys[2], (1, ctx_dim), jnp.float32),
        # frozen token-embedding buffers (random stand-ins for CLIP embeddings)
        "token_prefix": 0.1 * jax.random.normal(pkeys[3], (N, 1, ctx_dim), jnp.float32),
        "token_suffix": 0.1 * jax.random.normal(pkeys[4], (N, suffix_len, ctx_dim), jnp.float32),
        "compound_vis_mean": [
            0.02 * jax.random.normal(pkeys[5 + i], (n_ctx, vis_dim), jnp.float32)
            for i in range(depth - 1)],
        # PyTorch initializes these to zeros
        "compound_vis_sigma": [
            jnp.zeros((n_ctx, vis_dim), jnp.float32) for _ in range(depth - 1)],
        "compound_proj_w": [
            0.05 * jax.random.normal(pkeys[8 + i], (vis_dim, ctx_dim), jnp.float32)
            for i in range(depth - 1)],
        "compound_proj_b": [
            0.01 * jax.random.normal(pkeys[11 + i], (1, ctx_dim), jnp.float32)
            for i in range(depth - 1)],
    }

    # Persistent prompts buffer: built ONCE at init (frozen prefix/suffix).
    prompts_buf = init_prompts_buffer(params["token_prefix"],
                                      params["token_suffix"], n_ctx)

    # Donating the persistent buffer makes the forward's only HBM write the
    # n_ctx ctx rows (prefix/suffix are never re-streamed).
    fwd = jax.jit(functools.partial(prompt_learner_forward, cfg=cfg),
                  donate_argnums=(1,))

    rng = jax.random.PRNGKey(42)
    out = fwd(params, prompts_buf, rng)
    prompts, shared_ctx, compound_vis, text_deep, (eps_text, eps_vis) = out
    jax.block_until_ready((prompts, shared_ctx, compound_vis, text_deep))

    # ---- sanity checks against a plain-JAX reference ----
    assert prompts.shape == (N, seq_len, ctx_dim)
    assert shared_ctx.shape == (Lv, n_ctx, vis_dim)
    assert len(compound_vis) == depth - 1 and len(text_deep) == depth - 1

    eps_text_4d = np.asarray(eps_text).reshape(depth, Lt, n_ctx, ctx_dim)
    eps_vis_4d = np.asarray(eps_vis).reshape(depth, Lv, n_ctx, vis_dim)

    # text ctx + prompt assembly
    ctx_text_ref = ref_proj_sample(params["ctx_mean"], params["ctx_sigma"],
                                   params["proj_w"], params["proj_b"],
                                   jnp.asarray(eps_text_4d[0]))
    ctx_expanded = jnp.broadcast_to(
        ctx_text_ref[None], (n_cls, Lt, n_ctx, ctx_dim)).reshape(N, n_ctx, ctx_dim)
    prompts_ref = jnp.concatenate(
        [params["token_prefix"], ctx_expanded, params["token_suffix"]], axis=1)
    np.testing.assert_allclose(np.asarray(prompts), np.asarray(prompts_ref),
                               rtol=1e-5, atol=1e-5)

    # shared vision ctx
    shared_ref = ref_sample(params["ctx_mean"], params["ctx_sigma"],
                            jnp.asarray(eps_vis_4d[0]))
    np.testing.assert_allclose(np.asarray(shared_ctx), np.asarray(shared_ref),
                               rtol=1e-5, atol=1e-5)

    # compound vision prompts
    for i in range(depth - 1):
        ref_i = ref_sample(params["compound_vis_mean"][i],
                           params["compound_vis_sigma"][i],
                           jnp.asarray(eps_vis_4d[i + 1]))
        np.testing.assert_allclose(np.asarray(compound_vis[i]), np.asarray(ref_i),
                                   rtol=1e-5, atol=1e-5)

    # deep text prompts
    for i in range(depth - 1):
        ref_i = ref_proj_sample(params["compound_vis_mean"][i],
                                params["compound_vis_sigma"][i],
                                params["compound_proj_w"][i],
                                params["compound_proj_b"][i],
                                jnp.asarray(eps_text_4d[i + 1]))
        np.testing.assert_allclose(np.asarray(text_deep[i]), np.asarray(ref_i),
                                   rtol=1e-5, atol=1e-5)

    print("KERNEL_OK")
</pallas_src>

<mosaic_0001>
module attributes {stable_mosaic.version = 11 : i64} {
  func.func @sample_all_kernel(%arg0: i32, %arg1: memref<3x8x128xf32, #tpu.memory_space<vmem>>, %arg2: memref<3x128x128xf32, #tpu.memory_space<vmem>>, %arg3: memref<3x1x128xf32, #tpu.memory_space<vmem>>, %arg4: memref<3x8x128xf32, #tpu.memory_space<vmem>>, %arg5: memref<3x8x128xf32, #tpu.memory_space<vmem>>, %arg6: memref<3x8x128xf32, #tpu.memory_space<vmem>>, %arg7: memref<3x8x128xf32, #tpu.memory_space<vmem>>) attributes {dimension_semantics = [#tpu.dimension_semantics<arbitrary>], iteration_bounds = array<i64: 1>, scalar_prefetch = 0 : i64, scratch_operands = 0 : i64, tpu.core_type = #tpu.core_type<tc>, window_params = [{pipeline_mode = #tpu.pipeline_mode<synchronous>, transform_indices = @transform_0, window_bounds = array<i64: 3, 8, 128>}, {pipeline_mode = #tpu.pipeline_mode<synchronous>, transform_indices = @transform_1, window_bounds = array<i64: 3, 128, 128>}, {pipeline_mode = #tpu.pipeline_mode<synchronous>, transform_indices = @transform_2, window_bounds = array<i64: 3, 1, 128>}, {pipeline_mode = #tpu.pipeline_mode<synchronous>, transform_indices = @transform_3, window_bounds = array<i64: 3, 8, 128>}, {pipeline_mode = #tpu.pipeline_mode<synchronous>, transform_indices = @transform_4, window_bounds = array<i64: 3, 8, 128>}, {pipeline_mode = #tpu.pipeline_mode<synchronous>, transform_indices = @transform_5, window_bounds = array<i64: 3, 8, 128>}, {pipeline_mode = #tpu.pipeline_mode<synchronous>, transform_indices = @transform_6, window_bounds = array<i64: 3, 8, 128>}]} {
    %c0 = arith.constant 0 : index
    %c0_0 = arith.constant 0 : index
    %c0_1 = arith.constant 0 : index
    %0 = vector.load %arg1[%c0, %c0_0, %c0_1] : memref<3x8x128xf32, #tpu.memory_space<vmem>>, vector<3x8x128xf32>
    %c0_2 = arith.constant 0 : index
    %c0_3 = arith.constant 0 : index
    %c0_4 = arith.constant 0 : index
    %1 = vector.load %arg2[%c0_2, %c0_3, %c0_4] : memref<3x128x128xf32, #tpu.memory_space<vmem>>, vector<3x128x128xf32>
    %cst = arith.constant dense<0.000000e+00> : vector<3x8x128xf32>
    %2 = tpu.matmul %0, %1, %cst {dimension_numbers = #tpu.dot_dimension_numbers<[2], [1], [1], [2], [0, 0, 0, 1, 1, 2], [0], [0]>} : vector<3x8x128xf32>, vector<3x128x128xf32>, vector<3x8x128xf32> -> vector<3x8x128xf32>
    %c0_5 = arith.constant 0 : index
    %c0_6 = arith.constant 0 : index
    %c0_7 = arith.constant 0 : index
    %3 = vector.load %arg3[%c0_5, %c0_6, %c0_7] : memref<3x1x128xf32, #tpu.memory_space<vmem>>, vector<3x1x128xf32>
    %4 = vector.broadcast %3 : vector<3x1x128xf32> to vector<3x8x128xf32>
    %5 = arith.addf %2, %4 : vector<3x8x128xf32>
    %6 = vector.extract_strided_slice %5 {offsets = [0, 0, 0], sizes = [3, 4, 128], strides = [1, 1, 1]} : vector<3x8x128xf32> to vector<3x4x128xf32>
    %7 = vector.extract_strided_slice %5 {offsets = [0, 4, 0], sizes = [3, 4, 128], strides = [1, 1, 1]} : vector<3x8x128xf32> to vector<3x4x128xf32>
    %cst_8 = arith.constant 5.000000e-01 : f32
    %8 = vector.broadcast %cst_8 : f32 to vector<3x4x128xf32>
    %9 = arith.mulf %8, %7 : vector<3x4x128xf32>
    %10 = math.exp %9 : vector<3x4x128xf32>
    %11 = vector.extract_strided_slice %0 {offsets = [0, 0, 0], sizes = [3, 4, 128], strides = [1, 1, 1]} : vector<3x8x128xf32> to vector<3x4x128xf32>
    %12 = vector.extract_strided_slice %0 {offsets = [0, 4, 0], sizes = [3, 4, 128], strides = [1, 1, 1]} : vector<3x8x128xf32> to vector<3x4x128xf32>
    %cst_9 = arith.constant 5.000000e-01 : f32
    %13 = vector.broadcast %cst_9 : f32 to vector<3x4x128xf32>
    %14 = arith.mulf %13, %12 : vector<3x4x128xf32>
    %15 = math.exp %14 : vector<3x4x128xf32>
    %c0_10 = arith.constant 0 : index
    %c0_11 = arith.constant 0 : index
    %c0_12 = arith.constant 0 : index
    %16 = vector.load %arg4[%c0_10, %c0_11, %c0_12] : memref<3x8x128xf32, #tpu.memory_space<vmem>>, vector<3x4x128xf32>
    %17 = arith.mulf %16, %10 : vector<3x4x128xf32>
    %18 = arith.addf %6, %17 : vector<3x4x128xf32>
    %c0_13 = arith.constant 0 : index
    %c0_14 = arith.constant 0 : index
    %c0_15 = arith.constant 0 : index
    %19 = vector.load %arg6[%c0_13, %c0_14, %c0_15] : memref<3x8x128xf32, #tpu.memory_space<vmem>>, vector<3x4x128xf32>
    tpu.vector_store %arg6[%c0_13, %c0_14, %c0_15], %18 {strides = array<i32>} : memref<3x8x128xf32, #tpu.memory_space<vmem>>, vector<3x4x128xf32>,
    %c0_16 = arith.constant 0 : index
    %c4 = arith.constant 4 : index
    %c0_17 = arith.constant 0 : index
    %20 = vector.load %arg4[%c0_16, %c4, %c0_17] : memref<3x8x128xf32, #tpu.memory_space<vmem>>, vector<3x4x128xf32>
    %21 = arith.mulf %20, %10 : vector<3x4x128xf32>
    %22 = arith.addf %6, %21 : vector<3x4x128xf32>
    %c0_18 = arith.constant 0 : index
    %c4_19 = arith.constant 4 : index
    %c0_20 = arith.constant 0 : index
    %23 = vector.load %arg6[%c0_18, %c4_19, %c0_20] : memref<3x8x128xf32, #tpu.memory_space<vmem>>, vector<3x4x128xf32>
    tpu.vector_store %arg6[%c0_18, %c4_19, %c0_20], %22 {strides = array<i32>} : memref<3x8x128xf32, #tpu.memory_space<vmem>>, vector<3x4x128xf32>,
    %c0_21 = arith.constant 0 : index
    %c0_22 = arith.constant 0 : index
    %c0_23 = arith.constant 0 : index
    %24 = vector.load %arg5[%c0_21, %c0_22, %c0_23] : memref<3x8x128xf32, #tpu.memory_space<vmem>>, vector<3x4x128xf32>
    %25 = arith.mulf %24, %15 : vector<3x4x128xf32>
    %26 = arith.addf %11, %25 : vector<3x4x128xf32>
    %c0_24 = arith.constant 0 : index
    %c0_25 = arith.constant 0 : index
    %c0_26 = arith.constant 0 : index
    %27 = vector.load %arg7[%c0_24, %c0_25, %c0_26] : memref<3x8x128xf32, #tpu.memory_space<vmem>>, vector<3x4x128xf32>
    tpu.vector_store %arg7[%c0_24, %c0_25, %c0_26], %26 {strides = array<i32>} : memref<3x8x128xf32, #tpu.memory_space<vmem>>, vector<3x4x128xf32>,
    %c0_27 = arith.constant 0 : index
    %c4_28 = arith.constant 4 : index
    %c0_29 = arith.constant 0 : index
    %28 = vector.load %arg5[%c0_27, %c4_28, %c0_29] : memref<3x8x128xf32, #tpu.memory_space<vmem>>, vector<3x4x128xf32>
    %29 = arith.mulf %28, %15 : vector<3x4x128xf32>
    %30 = arith.addf %11, %29 : vector<3x4x128xf32>
    %c0_30 = arith.constant 0 : index
    %c4_31 = arith.constant 4 : index
    %c0_32 = arith.constant 0 : index
    %31 = vector.load %arg7[%c0_30, %c4_31, %c0_32] : memref<3x8x128xf32, #tpu.memory_space<vmem>>, vector<3x4x128xf32>
    tpu.vector_store %arg7[%c0_30, %c4_31, %c0_32], %30 {strides = array<i32>} : memref<3x8x128xf32, #tpu.memory_space<vmem>>, vector<3x4x128xf32>,
    return
  }
  func.func @transform_0(%arg0: i32) -> (i32, i32, i32) {
    %c0_i32 = arith.constant 0 : i32
    %c0_i32_0 = arith.constant 0 : i32
    %c0_i32_1 = arith.constant 0 : i32
    %c0_i32_2 = arith.constant 0 : i32
    return %c0_i32, %c0_i32_0, %c0_i32_1 : i32, i32, i32
  }
  func.func @transform_1(%arg0: i32) -> (i32, i32, i32) {
    %c0_i32 = arith.constant 0 : i32
    %c0_i32_0 = arith.constant 0 : i32
    %c0_i32_1 = arith.constant 0 : i32
    %c0_i32_2 = arith.constant 0 : i32
    return %c0_i32, %c0_i32_0, %c0_i32_1 : i32, i32, i32
  }
  func.func @transform_2(%arg0: i32) -> (i32, i32, i32) {
    %c0_i32 = arith.constant 0 : i32
    %c0_i32_0 = arith.constant 0 : i32
    %c0_i32_1 = arith.constant 0 : i32
    %c0_i32_2 = arith.constant 0 : i32
    return %c0_i32, %c0_i32_0, %c0_i32_1 : i32, i32, i32
  }
  func.func @transform_3(%arg0: i32) -> (i32, i32, i32) {
    %c0_i32 = arith.constant 0 : i32
    %c0_i32_0 = arith.constant 0 : i32
    %c0_i32_1 = arith.constant 0 : i32
    %c0_i32_2 = arith.constant 0 : i32
    return %c0_i32, %c0_i32_0, %c0_i32_1 : i32, i32, i32
  }
  func.func @transform_4(%arg0: i32) -> (i32, i32, i32) {
    %c0_i32 = arith.constant 0 : i32
    %c0_i32_0 = arith.constant 0 : i32
    %c0_i32_1 = arith.constant 0 : i32
    %c0_i32_2 = arith.constant 0 : i32
    return %c0_i32, %c0_i32_0, %c0_i32_1 : i32, i32, i32
  }
  func.func @transform_5(%arg0: i32) -> (i32, i32, i32) {
    %c0_i32 = arith.constant 0 : i32
    %c0_i32_0 = arith.constant 0 : i32
    %c0_i32_1 = arith.constant 0 : i32
    %c0_i32_2 = arith.constant 0 : i32
    return %c0_i32, %c0_i32_0, %c0_i32_1 : i32, i32, i32
  }
  func.func @transform_6(%arg0: i32) -> (i32, i32, i32) {
    %c0_i32 = arith.constant 0 : i32
    %c0_i32_0 = arith.constant 0 : i32
    %c0_i32_1 = arith.constant 0 : i32
    %c0_i32_2 = arith.constant 0 : i32
    return %c0_i32, %c0_i32_0, %c0_i32_1 : i32, i32, i32
  }
}

module attributes {stable_mosaic.version = 11 : i64} {
  func.func @scatter_ctx_kernel(%arg0: i32, %arg1: memref<6x16x128xf32, #tpu.memory_space<any>>, %arg2: memref<6x4x128xf32, #tpu.memory_space<vmem>>, %arg3: memref<6x16x128xf32, #tpu.memory_space<any>>, %arg4: memref<4x!tpu.dma_semaphore, #tpu.memory_space<semaphore_mem>>) attributes {dimension_semantics = [#tpu.dimension_semantics<arbitrary>], iteration_bounds = array<i64: 1>, scalar_prefetch = 0 : i64, scratch_operands = 1 : i64, tpu.core_type = #tpu.core_type<tc>, window_params = [{}, {pipeline_mode = #tpu.pipeline_mode<synchronous>, transform_indices = @transform_1, window_bounds = array<i64: 6, 4, 128>}, {}]} {
    %c0_i32 = arith.constant 0 : i32
    %c1_i32 = arith.constant 1 : i32
    %0 = arith.muli %c0_i32, %c1_i32 : i32
    %c0_i32_0 = arith.constant 0 : i32
    %1 = arith.addi %c0_i32_0, %0 : i32
    %c4_i32 = arith.constant 4 : i32
    %c0_i32_1 = arith.constant 0 : i32
    %2 = arith.cmpi eq, %c4_i32, %c0_i32_1 : i32
    %c1_i32_2 = arith.constant 1 : i32
    %3 = arith.select %2, %c1_i32_2, %c4_i32 : i32
    %4 = arith.remsi %1, %3 : i32
    %c0_i32_3 = arith.constant 0 : i32
    %5 = arith.cmpi ne, %4, %c0_i32_3 : i32
    %c0_i32_4 = arith.constant 0 : i32
    %6 = arith.cmpi slt, %4, %c0_i32_4 : i32
    %c0_i32_5 = arith.constant 0 : i32
    %7 = arith.cmpi slt, %3, %c0_i32_5 : i32
    %8 = arith.xori %6, %7 : i1
    %9 = arith.andi %8, %5 : i1
    %10 = arith.addi %4, %3 : i32
    %11 = arith.select %9, %10, %4 : i32
    %c4_i32_6 = arith.constant 4 : i32
    %12 = arith.cmpi sge, %1, %c4_i32_6 : i32
    %13 = arith.extui %12 : i1 to i32
    %c0_i32_7 = arith.constant 0 : i32
    %14 = arith.cmpi ne, %13, %c0_i32_7 : i32
    scf.if %14 {
      %c4_i32_21 = arith.constant 4 : i32
      %25 = arith.subi %1, %c4_i32_21 : i32
      %c3_i32_22 = arith.constant 3 : i32
      %26 = arith.muli %25, %c3_i32_22 : i32
      %c2_i32_23 = arith.constant 2 : i32
      %27 = arith.muli %26, %c2_i32_23 : i32
      %c0_i32_24 = arith.constant 0 : i32
      %c0_i32_25 = arith.constant 0 : i32
      %c0_i32_26 = arith.constant 0 : i32
      %28 = tpu.memref_slice %arg2[%c0_i32_24, %c0_i32_25, %c0_i32_26] : memref<6x4x128xf32, #tpu.memory_space<vmem>> -> memref<6x4x128xf32, #tpu.memory_space<vmem>>
      %c1_i32_27 = arith.constant 1 : i32
      %c0_i32_28 = arith.constant 0 : i32
      %29 = tpu.memref_slice %arg3[%27, %c1_i32_27, %c0_i32_28] : memref<6x16x128xf32, #tpu.memory_space<any>> -> memref<6x4x128xf32, #tpu.memory_space<any>>
      %30 = tpu.memref_slice %arg4[%11] : memref<4x!tpu.dma_semaphore, #tpu.memory_space<semaphore_mem>> -> memref<1x!tpu.dma_semaphore, #tpu.memory_space<semaphore_mem>>
      %31 = tpu.memref_squeeze %30 : memref<1x!tpu.dma_semaphore, #tpu.memory_space<semaphore_mem>> -> memref<!tpu.dma_semaphore, #tpu.memory_space<semaphore_mem>>
      tpu.wait_dma2 semaphore(%31 : memref<!tpu.dma_semaphore, #tpu.memory_space<semaphore_mem>>) src(%28 : memref<6x4x128xf32, #tpu.memory_space<vmem>>) dst(%29 : memref<6x4x128xf32, #tpu.memory_space<any>>)
    } else {
    }
    %c3_i32 = arith.constant 3 : i32
    %15 = arith.muli %1, %c3_i32 : i32
    %c2_i32 = arith.constant 2 : i32
    %16 = arith.muli %15, %c2_i32 : i32
    %c0_i32_8 = arith.constant 0 : i32
    %c0_i32_9 = arith.constant 0 : i32
    %c0_i32_10 = arith.constant 0 : i32
    %17 = tpu.memref_slice %arg2[%c0_i32_8, %c0_i32_9, %c0_i32_10] : memref<6x4x128xf32, #tpu.memory_space<vmem>> -> memref<6x4x128xf32, #tpu.memory_space<vmem>>
    %c1_i32_11 = arith.constant 1 : i32
    %c0_i32_12 = arith.constant 0 : i32
    %18 = tpu.memref_slice %arg3[%16, %c1_i32_11, %c0_i32_12] : memref<6x16x128xf32, #tpu.memory_space<any>> -> memref<6x4x128xf32, #tpu.memory_space<any>>
    %19 = tpu.memref_slice %arg4[%11] : memref<4x!tpu.dma_semaphore, #tpu.memory_space<semaphore_mem>> -> memref<1x!tpu.dma_semaphore, #tpu.memory_space<semaphore_mem>>
    %20 = tpu.memref_squeeze %19 : memref<1x!tpu.dma_semaphore, #tpu.memory_space<semaphore_mem>> -> memref<!tpu.dma_semaphore, #tpu.memory_space<semaphore_mem>>
    tpu.enqueue_dma source(%17 : memref<6x4x128xf32, #tpu.memory_space<vmem>>) target(%18 : memref<6x4x128xf32, #tpu.memory_space<any>>) target_semaphore(%20 : memref<!tpu.dma_semaphore, #tpu.memory_space<semaphore_mem>>)
    %c1_i32_13 = arith.constant 1 : i32
    %c0_i32_14 = arith.constant 0 : i32
    %c0_i32_15 = arith.constant 0 : i32
    %c0_i32_16 = arith.constant 0 : i32
    %c0_i32_17 = arith.constant 0 : i32
    %21 = tpu.memref_slice %arg2[%c0_i32_15, %c0_i32_16, %c0_i32_17] : memref<6x4x128xf32, #tpu.memory_space<vmem>> -> memref<6x4x128xf32, #tpu.memory_space<vmem>>
    %c0_i32_18 = arith.constant 0 : i32
    %c1_i32_19 = arith.constant 1 : i32
    %c0_i32_20 = arith.constant 0 : i32
    %22 = tpu.memref_slice %arg3[%c0_i32_18, %c1_i32_19, %c0_i32_20] : memref<6x16x128xf32, #tpu.memory_space<any>> -> memref<6x4x128xf32, #tpu.memory_space<any>>
    %23 = tpu.memref_slice %arg4[%c0_i32_14] : memref<4x!tpu.dma_semaphore, #tpu.memory_space<semaphore_mem>> -> memref<1x!tpu.dma_semaphore, #tpu.memory_space<semaphore_mem>>
    %24 = tpu.memref_squeeze %23 : memref<1x!tpu.dma_semaphore, #tpu.memory_space<semaphore_mem>> -> memref<!tpu.dma_semaphore, #tpu.memory_space<semaphore_mem>>
    tpu.wait_dma2 semaphore(%24 : memref<!tpu.dma_semaphore, #tpu.memory_space<semaphore_mem>>) src(%21 : memref<6x4x128xf32, #tpu.memory_space<vmem>>) dst(%22 : memref<6x4x128xf32, #tpu.memory_space<any>>)
    return
  }
  func.func @transform_1(%arg0: i32) -> (i32, i32, i32) {
    %c0_i32 = arith.constant 0 : i32
    %c0_i32_0 = arith.constant 0 : i32
    %c0_i32_1 = arith.constant 0 : i32
    %c0_i32_2 = arith.constant 0 : i32
    return %c0_i32, %c0_i32_0, %c0_i32_1 : i32, i32, i32
  }
}

</mosaic_0001>

<bundles_post_ra>
// kernel: prompt_learner_forward.4
= control target key start
LH: loop header
LB: loop body
LE: loop exit
PB: predicated region body
PF: predicated region fallthrough
CT: control target
= control target key end

     0   :  { %v642_v0 = vmov 0.0|0.0   ;;  %vm643_vm0 = vmmov 0   ;;  %v644_v6 = vmov 0.0   ;;  %s962_s1 = inlined_call_operand.vmem [shape: f32[3,128,128], index: 1, kind: input, shape index: {}]   ;;  %s963_s0 = inlined_call_operand.vmem [shape: f32[3,8,128], index: 0, kind: input, shape index: {}]   ;;  %s964_s4 = inlined_call_operand.vmem [shape: f32[3,8,128], index: 4, kind: input, shape index: {}]   ;;  %s965_s6 = inlined_call_operand.vmem [shape: f32[3,8,128], index: 6, kind: output, shape index: {1}]   ;;  %s966_s2 = inlined_call_operand.vmem [shape: f32[3,1,128], index: 2, kind: input, shape index: {}]   ;;  %s967_s3 = inlined_call_operand.vmem [shape: f32[3,8,128], index: 3, kind: input, shape index: {}]   ;;  %s968_s5 = inlined_call_operand.vmem [shape: f32[3,8,128], index: 5, kind: output, shape index: {0}]  }
   0x1   :  { %555 = vmatprep.subr.bf16.mxu0 %v642_v0  ;;  %v25_v1 = vld [vmem:[%s962_s1] sm:$0xff]  ;;  %v26_v2 = vld [vmem:[%s962_s1 + $0x8] sm:$0xff]  ;;  %v27_v3 = vld [vmem:[%s962_s1 + $0x10] sm:$0xff]  ;;  %579 = vmatprep.subr.bf16.mxu1 %v642_v0 }
   0x2   :  { %v556_v4 = vpack.c.bf16 %v26_v2, %v25_v1  ;;  %v28_v5 = vld [vmem:[%s962_s1 + $0x18] sm:$0xff]  ;;  %482 = vmatprep.mubr.msk.f32.mxu0 %vm643_vm0, %v644_v6  ;;  %517 = vmatprep.mubr.msk.f32.mxu1 %vm643_vm0, %v644_v6  ;;  %v41_v7 = vld [vmem:[%s962_s1 + $0x80] sm:$0xff]  ;;  %v42_v10 = vld [vmem:[%s962_s1 + $0x88] sm:$0xff] }
   0x3   :  { %v559_v8 = vpack.c.bf16 %v28_v5, %v27_v3  ;;  %v29_v9 = vld [vmem:[%s962_s1 + $0x20] sm:$0xff]  ;;  %v30_v11 = vld [vmem:[%s962_s1 + $0x28] sm:$0xff]  ;;  %v580_v12 = vpack.c.bf16 %v42_v10, %v41_v7  ;;  %v43_v13 = vld [vmem:[%s962_s1 + $0x90] sm:$0xff] }
   0x4   :  { %557 = vmatpush3.bf16.msra.mxu0 %v556_v4  ;;  %v44_v14 = vld [vmem:[%s962_s1 + $0x98] sm:$0xff]  ;;  %v562_v16 = vpack.c.bf16 %v30_v11, %v29_v9  ;;  %v45_v17 = vld [vmem:[%s962_s1 + $0xa0] sm:$0xff]  ;;  %v46_v18 = vld [vmem:[%s962_s1 + $0xa8] sm:$0xff] }
   0x5   :  { %558 = vmatprep.subr.bf16.mxu0 %v642_v0  ;;  %581 = vmatpush3.bf16.msra.mxu1 %v580_v12  ;;  %v583_v15 = vpack.c.bf16 %v44_v14, %v43_v13  ;;  %v31_v19 = vld [vmem:[%s962_s1 + $0x30] sm:$0xff]  ;;  %v32_v20 = vld [vmem:[%s962_s1 + $0x38] sm:$0xff]  ;;  %v734_v21 = vld [vmem:[%s963_s0] sm:$0xff]  ;;  %v586_v23 = vpack.c.bf16 %v46_v18, %v45_v17 }
   0x6   :  { %582 = vmatprep.subr.bf16.mxu1 %v642_v0  ;;  %v313_v22 = vmul.f32 0.5, %v734_v21  ;;  %v565_v24 = vpack.c.bf16 %v32_v20, %v31_v19  ;;  %v47_v25 = vld [vmem:[%s962_s1 + $0xb0] sm:$0xff]  ;;  %v48_v26 = vld [vmem:[%s962_s1 + $0xb8] sm:$0xff]  ;;  %v33_v28 = vld [vmem:[%s962_s1 + $0x40] sm:$0xff] }
   0x7   :  { %v34_v29 = vld [vmem:[%s962_s1 + $0x48] sm:$0xff]  ;;  %v589_v31 = vpack.c.bf16 %v48_v26, %v47_v25  ;;  %v49_v34 = vld [vmem:[%s962_s1 + $0xc0] sm:$0xff]  ;;  %v35_v36 = vld [vmem:[%s962_s1 + $0x50] sm:$0xff] }
   0x8   :  { %560 = vmatpush3.bf16.msra.mxu0 %v559_v8  ;;  %v316_v27 = vmul.f32 1.442695, %v313_v22  ;;  %v754_v30 = vld [vmem:[%s963_s0 + $0x8] sm:$0xff]  ;;  %v568_v33 = vpack.c.bf16 %v34_v29, %v33_v28  ;;  %v36_v37 = vld [vmem:[%s962_s1 + $0x58] sm:$0xff]  ;;  %v774_v40 = vld [vmem:[%s963_s0 + $0x10] sm:$0xff] }
   0x9   :  { %561 = vmatprep.subr.bf16.mxu0 %v642_v0  ;;  %584 = vmatpush3.bf16.msra.mxu1 %v583_v15  ;;  %v314_v32 = vmul.f32 0.5, %v754_v30  ;;  %v50_v35 = vld [vmem:[%s962_s1 + $0xc8] sm:$0xff]  ;;  %v571_v41 = vpack.c.bf16 %v36_v37, %v35_v36  ;;  %v51_v42 = vld [vmem:[%s962_s1 + $0xd0] sm:$0xff]  ;;  %v52_v43 = vld [vmem:[%s962_s1 + $0xd8] sm:$0xff]  ;;  %v315_v44 = vmul.f32 0.5, %v774_v40 }
   0xa   :  { %585 = vmatprep.subr.bf16.mxu1 %v642_v0  ;;  %630 = vpow2.f32 %v316_v27  ;;  %v592_v39 = vpack.c.bf16 %v50_v35, %v49_v34  ;;  %v37_v45 = vld [vmem:[%s962_s1 + $0x60] sm:$0xff]  ;;  %v38_v46 = vld [vmem:[%s962_s1 + $0x68] sm:$0xff]  ;;  %v595_v49 = vpack.c.bf16 %v52_v43, %v51_v42  ;;  %v39_v55 = vld [vmem:[%s962_s1 + $0x70] sm:$0xff] }
   0xb   :  { %v318_v38 = vmul.f32 1.442695, %v314_v32  ;;  %v320_v47 = vmul.f32 1.442695, %v315_v44  ;;  %v355_v48 = vld [vmem:[%s964_s4] sm:$0xf]  ;;  %v574_v51 = vpack.c.bf16 %v38_v46, %v37_v45 }
   0xc   :  { %563 = vmatpush3.bf16.msra.mxu0 %v562_v16  ;;  %v376_v52 = vld [vmem:[%s964_s4 + $0x4] sm:$0xf]  ;;  %v54_v54 = vld [vmem:[%s962_s1 + $0xe8] sm:$0xff]  ;;  %v40_v56 = vld [vmem:[%s962_s1 + $0x78] sm:$0xff] }
   0xd   :  { %564 = vmatprep.subr.bf16.mxu0 %v642_v0  ;;  %587 = vmatpush3.bf16.msra.mxu1 %v586_v23  ;;  %632 = vpow2.f32 %v318_v38  ;;  %v53_v53 = vld [vmem:[%s962_s1 + $0xe0] sm:$0xff]  ;;  %v577_v61 = vpack.c.bf16 %v40_v56, %v39_v55  ;;  %v55_v63 = vld [vmem:[%s962_s1 + $0xf0] sm:$0xff]  ;;  %v56_v1 = vld [vmem:[%s962_s1 + $0xf8] sm:$0xff] }
   0xe   :  { %588 = vmatprep.subr.bf16.mxu1 %v642_v0  ;;  %634 = vpow2.f32 %v320_v47  ;;  %v598_v60 = vpack.c.bf16 %v54_v54, %v53_v53  ;;  %v57_v62 = vld [vmem:[%s962_s1 + $0x100] sm:$0xff]  ;;  %v58_v5 = vld [vmem:[%s962_s1 + $0x108] sm:$0xff]  ;;  %v601_v10 = vpack.c.bf16 %v56_v1, %v55_v63  ;;  %v59_v14 = vld [vmem:[%s962_s1 + $0x110] sm:$0xff] }
   0xf   :  { %v356_v7 = vld [vmem:[%s964_s4 + $0x8] sm:$0xf]  ;;  %v377_v8 = vld [vmem:[%s964_s4 + $0xc] sm:$0xf]  ;;  %v604_v11 = vpack.c.bf16 %v58_v5, %v57_v62  ;;  %v60_v15 = vld [vmem:[%s962_s1 + $0x118] sm:$0xff] }
  0x10   :  { %566 = vmatpush3.bf16.msra.mxu0 %v565_v24  ;;  %v357_v19 = vld [vmem:[%s964_s4 + $0x10] sm:$0xf]  ;;  %v378_v20 = vld [vmem:[%s964_s4 + $0x14] sm:$0xf]  ;;  %v607_v23 = vpack.c.bf16 %v60_v15, %v59_v14  ;;  %v62_v24 = vld [vmem:[%s962_s1 + $0x128] sm:$0xff] }
  0x11   :  { %567 = vmatprep.subr.bf16.mxu0 %v642_v0  ;;  %590 = vmatpush3.bf16.msra.mxu1 %v589_v31  ;;  %v63_v29 = vld [vmem:[%s962_s1 + $0x130] sm:$0xff]  ;;  %v64_v31 = vld [vmem:[%s962_s1 + $0x138] sm:$0xff]  ;;  %v65_v32 = vld [vmem:[%s962_s1 + $0x140] sm:$0xff] }
  0x12   :  { %591 = vmatprep.subr.bf16.mxu1 %v642_v0  ;;  %v67_v35 = vld [vmem:[%s962_s1 + $0x150] sm:$0xff]  ;;  %v68_v36 = vld [vmem:[%s962_s1 + $0x158] sm:$0xff]  ;;  %v69_v38 = vld [vmem:[%s962_s1 + $0x160] sm:$0xff] }
  0x13   :  { %v619_v37 = vpack.c.bf16 %v68_v36, %v67_v35  ;;  %v71_v42 = vld [vmem:[%s962_s1 + $0x170] sm:$0xff]  ;;  %v72_v43 = vld [vmem:[%s962_s1 + $0x178] sm:$0xff]  ;;  %v396_v45 = vld [vmem:[%s966_s2] ss:$0 sm:$0xff] }
  0x14   :  { %569 = vmatpush3.bf16.msra.mxu0 %v568_v33  ;;  %v631_v50 = vpop.eup %630  ;;  %v66_v33 = vld [vmem:[%s962_s1 + $0x148] sm:$0xff]  ;;  %v625_v44 = vpack.c.bf16 %v72_v43, %v71_v42  ;;  %v322_v56 = vld [vmem:[%s967_s3] sm:$0xf] }
  0x15   :  { %570 = vmatprep.subr.bf16.mxu0 %v642_v0  ;;  %593 = vmatpush3.bf16.msra.mxu1 %v592_v39  ;;  %v361_v57 = vrot.slane %v631_v50, 4  ;;  %v616_v34 = vpack.c.bf16 %v66_v33, %v65_v32  ;;  %v70_v39 = vld [vmem:[%s962_s1 + $0x168] sm:$0xff] }
  0x16   :  { %594 = vmatprep.subr.bf16.mxu1 %v642_v0  ;;  %v323_v62 = vld [vmem:[%s967_s3 + $0x8] sm:$0xf]  ;;  %v344_v63 = vld [vmem:[%s967_s3 + $0xc] sm:$0xf] }
  0x17   :  { %v367_v58 = vmul.f32 %v361_v57, %v355_v48  ;;  %v379_v59 = vmul.f32 %v376_v52, %v361_v57  ;;  %v633_v2 = vpop.eup %632  ;;  %v343_v57 = vld [vmem:[%s967_s3 + $0x4] sm:$0xf] }
  0x18   :  { %572 = vmatpush3.bf16.msra.mxu0 %v571_v41  ;;  %v362_v9 = vrot.slane %v633_v2, 4  ;;  %v635_v16 = vpop.eup %634  ;;  %v622_v41 = vpack.c.bf16 %v70_v39, %v69_v38 }
  0x19   :  { %573 = vmatprep.subr.bf16.mxu0 %v642_v0  ;;  %596 = vmatpush3.bf16.msra.mxu1 %v595_v49  ;;  %v370_v3 = vadd.f32 %v367_v58, %v734_v21  ;;  %v382_v4 = vadd.f32 %v379_v59, %v734_v21  ;;  %v363_v22 = vrot.slane %v635_v16, 4  ;;  %v397_v49 = vld [vmem:[%s966_s2 + $0x1] ss:$0 sm:$0xff]  ;;  %v324_v16 = vld [vmem:[%s967_s3 + $0x10] sm:$0xf] }
  0x1a   :  { %597 = vmatprep.subr.bf16.mxu1 %v642_v0  ;;  %v368_v12 = vmul.f32 %v362_v9, %v356_v7  ;;  %v380_v13 = vmul.f32 %v377_v8, %v362_v9  ;;  %v398_v9 = vld [vmem:[%s966_s2 + $0x2] ss:$0 sm:$0xff] }
  0x1b   :  { %373 = vst [vmem:[%s965_s6] sm:$0xf] %v370_v3  ;;  %385 = vst [vmem:[%s965_s6 + $0x4] sm:$0xf] %v382_v4  ;;  %v369_v25 = vmul.f32 %v363_v22, %v357_v19  ;;  %v381_v26 = vmul.f32 %v378_v20, %v363_v22 }
  0x1c   :  { %575 = vmatpush3.bf16.msra.mxu0 %v574_v51  ;;  %v371_v17 = vadd.f32 %v368_v12, %v754_v30  ;;  %v383_v18 = vadd.f32 %v380_v13, %v754_v30 }
  0x1d   :  { %576 = vmatprep.subr.bf16.mxu0 %v642_v0  ;;  %599 = vmatpush3.bf16.msra.mxu1 %v598_v60  ;;  %v372_v27 = vadd.f32 %v369_v25, %v774_v40  ;;  %v384_v28 = vadd.f32 %v381_v26, %v774_v40 }
  0x1e   :  { %600 = vmatprep.subr.bf16.mxu1 %v642_v0  ;;  %374 = vst [vmem:[%s965_s6 + $0x8] sm:$0xf] %v371_v17  ;;  %386 = vst [vmem:[%s965_s6 + $0xc] sm:$0xf] %v383_v18  ;;  %v345_v17 = vld [vmem:[%s967_s3 + $0x14] sm:$0xf] }
  0x1f   :  { %375 = vst [vmem:[%s965_s6 + $0x10] sm:$0xf] %v372_v27  ;;  %387 = vst [vmem:[%s965_s6 + $0x14] sm:$0xf] %v384_v28 }
  0x20   :  { %578 = vmatpush3.bf16.msra.mxu0 %v577_v61 }
  0x21   :  { %603 = vmatprep.subr.bf16.mxu0 %v642_v0  ;;  %602 = vmatpush3.bf16.msra.mxu1 %v601_v10 }
  0x23   :  { %483 = vmatmul.mubr.f32.vlgmr.msra.gmra.mrb[0].mxu0 %v734_v21  ;;  %v61_v21 = vld [vmem:[%s962_s1 + $0x120] sm:$0xff] }
  0x24   :  { %605 = vmatpush3.bf16.msra.mxu0 %v604_v11  ;;  %552 = vmatprep.mubr.msk.f32.mxu0 %vm643_vm0, %v644_v6  ;;  %v610_v6 = vpack.c.bf16 %v62_v24, %v61_v21 }
  0x25   :  { %606 = vmatprep.subr.bf16.mxu0 %v642_v0  ;;  %518 = vmatmul.mubr.f32.vlgmr.msra.gmra.mrb[0].mxu1 %v754_v30  ;;  %v613_v30 = vpack.c.bf16 %v64_v31, %v63_v29 }
  0x28   :  { %608 = vmatpush3.bf16.msra.mxu0 %v607_v23 }
  0x29   :  { %609 = vmatprep.subr.bf16.mxu0 %v642_v0 }
  0x2c   :  { %611 = vmatpush3.bf16.msra.mxu0 %v610_v6 }
  0x2d   :  { %612 = vmatprep.subr.bf16.mxu0 %v642_v0 }
  0x30   :  { %614 = vmatpush3.bf16.msra.mxu0 %v613_v30 }
  0x31   :  { %615 = vmatprep.subr.bf16.mxu0 %v642_v0 }
  0x34   :  { %617 = vmatpush3.bf16.msra.mxu0 %v616_v34 }
  0x35   :  { %618 = vmatprep.subr.bf16.mxu0 %v642_v0 }
  0x38   :  { %620 = vmatpush3.bf16.msra.mxu0 %v619_v37 }
  0x39   :  { %621 = vmatprep.subr.bf16.mxu0 %v642_v0 }
  0x3c   :  { %623 = vmatpush3.bf16.msra.mxu0 %v622_v41 }
  0x3d   :  { %624 = vmatprep.subr.bf16.mxu0 %v642_v0 }
  0x40   :  { %626 = vmatpush3.bf16.msra.mxu0 %v625_v44 }
  0x43   :  { %553 = vmatmul.mubr.f32.vlgmr.msra.gmra.mrb[2].mxu0 %v774_v40 }
  0xf6   :  { %v160_v46 = vpop.f32.mrb[0].mxu0 }
  0xf7   :  { %v161_v47 = vadd.f32 %v396_v45, %v160_v46  ;;  %v484_v48 = vpop.f32.mrb[1].mxu0 }
  0xf8   :  { %v230_v51 = vpop.f32.mrb[0].mxu1 }
  0xf9   :  { %v304_v50 = vmul.f32 0.5, %v161_v47  ;;  %v231_v52 = vadd.f32 %v397_v49, %v230_v51  ;;  %v519_v53 = vpop.f32.mrb[1].mxu1 }
  0xfb   :  { %v307_v54 = vmul.f32 1.442695, %v304_v50  ;;  %v305_v0 = vmul.f32 0.5, %v231_v52 }
  0xfd   :  { %636 = vpow2.f32 %v307_v54  ;;  %v309_v55 = vmul.f32 1.442695, %v305_v0 }
  0xff   :  { %638 = vpow2.f32 %v309_v55 }
 0x107   :  { %v637_v40 = vpop.eup %636 }
 0x108   :  { %v328_v58 = vrot.slane %v637_v40, 4 }
 0x109   :  { %v639_v59 = vpop.eup %638 }
 0x10a   :  { %v334_v60 = vmul.f32 %v328_v58, %v322_v56  ;;  %v346_v61 = vmul.f32 %v343_v57, %v328_v58  ;;  %v329_v1 = vrot.slane %v639_v59, 4 }
 0x10c   :  { %v337_v2 = vadd.f32 %v334_v60, %v161_v47  ;;  %v349_v3 = vadd.f32 %v346_v61, %v161_v47  ;;  %v335_v4 = vmul.f32 %v329_v1, %v323_v62  ;;  %v347_v5 = vmul.f32 %v344_v63, %v329_v1 }
 0x10e   :  { %340 = vst [vmem:[%s968_s5] sm:$0xf] %v337_v2  ;;  %352 = vst [vmem:[%s968_s5 + $0x4] sm:$0xf] %v349_v3  ;;  %v338_v7 = vadd.f32 %v335_v4, %v231_v52  ;;  %v350_v8 = vadd.f32 %v347_v5, %v231_v52 }
 0x110   :  { %341 = vst [vmem:[%s968_s5 + $0x8] sm:$0xf] %v338_v7  ;;  %353 = vst [vmem:[%s968_s5 + $0xc] sm:$0xf] %v350_v8 }
 0x116   :  { %v300_v10 = vpop.f32.mrb[2].mxu0 }
 0x117   :  { %v301_v11 = vadd.f32 %v398_v9, %v300_v10  ;;  %v554_v12 = vpop.f32.mrb[3].mxu0 }
 0x119   :  { %v306_v13 = vmul.f32 0.5, %v301_v11 }
 0x11b   :  { %v311_v14 = vmul.f32 1.442695, %v306_v13 }
 0x11d   :  { %640 = vpow2.f32 %v311_v14 }
 0x127   :  { %v641_v15 = vpop.eup %640 }
 0x128   :  { %v330_v18 = vrot.slane %v641_v15, 4 }
 0x12a   :  { %v336_v19 = vmul.f32 %v330_v18, %v324_v16  ;;  %v348_v20 = vmul.f32 %v345_v17, %v330_v18 }
 0x12c   :  { %v339_v22 = vadd.f32 %v336_v19, %v301_v11  ;;  %v351_v23 = vadd.f32 %v348_v20, %v301_v11 }
 0x12e   :  { %342 = vst [vmem:[%s968_s5 + $0x10] sm:$0xf] %v339_v22  ;;  %354 = vst [vmem:[%s968_s5 + $0x14] sm:$0xf] %v351_v23 }

// kernel: prompt_learner_forward.5
= control target key start
LH: loop header
LB: loop body
LE: loop exit
PB: predicated region body
PF: predicated region fallthrough
CT: control target
= control target key end

     0   :  { %s197_s0 = inlined_call_operand.vmem [shape: f32[6,16,128], index: 0, kind: input, shape index: {}, may-alias: {0,2}]   ;;  %s198_s1 = inlined_call_operand.vmem [shape: f32[6,4,128], index: 1, kind: input, shape index: {}]   ;;  %s199_s2 = inlined_call_operand.vmem [shape: f32[6,16,128], index: 2, kind: output, shape index: {}, may-alias: {0,2}]  }
   0x1   :  { %v27_v0 = vld [vmem:[%s198_s1] sm:$0xf]  ;;  %v29_v1 = vld [vmem:[%s198_s1 + $0x4] sm:$0xf]  ;;  %v31_v2 = vld [vmem:[%s198_s1 + $0x8] sm:$0xf] }
   0x2   :  { %134 = vst [vmem:[%s199_s2 + $0x1] sm:$0xf] %v27_v0  ;;  %135 = vst [vmem:[%s199_s2 + $0x11] sm:$0xf] %v29_v1  ;;  %v33_v3 = vld [vmem:[%s198_s1 + $0xc] sm:$0xf] }
   0x3   :  { %136 = vst [vmem:[%s199_s2 + $0x21] sm:$0xf] %v31_v2  ;;  %v35_v4 = vld [vmem:[%s198_s1 + $0x10] sm:$0xf]  ;;  %v37_v5 = vld [vmem:[%s198_s1 + $0x14] sm:$0xf] }
   0x4   :  { %137 = vst [vmem:[%s199_s2 + $0x31] sm:$0xf] %v33_v3  ;;  %138 = vst [vmem:[%s199_s2 + $0x41] sm:$0xf] %v35_v4 }
   0x5   :  { %139 = vst [vmem:[%s199_s2 + $0x51] sm:$0xf] %v37_v5 }
   0x6   :  { %81 = vsyncadd [#allocation2], 384 }
   0x7   :  { %144 = dma.done.wait [#allocation2], 384 }
   0x8   :  { %145 = vsyncadd [#allocation2], 4294966912 }
   0x9   :  { %86 = vsyncmov [#allocation2] }
   0xc   :  { %s87_s4 = vpop.sfrf %86 }
   0xd   :  { %p140_p0 = scmp.ne.s32.totalorder %s87_s4, 0 }
   0xf   :  { %91 = shalt.err (%p140_p0)  }
  0x10   :  { %93 = vsyncmov [#allocation2 + $0x1] }
  0x13   :  { %s94_s1 = vpop.sfrf %93 }
  0x14   :  { %p141_p1 = scmp.ne.s32.totalorder %s94_s1, 0 }
  0x16   :  { %98 = shalt.err (%p141_p1)  }
  0x17   :  { %100 = vsyncmov [#allocation2 + $0x2] }
  0x1a   :  { %s101_s5 = vpop.sfrf %100 }
  0x1b   :  { %p142_p2 = scmp.ne.s32.totalorder %s101_s5, 0 }
  0x1d   :  { %105 = shalt.err (%p142_p2)  }
  0x1e   :  { %107 = vsyncmov [#allocation2 + $0x3] }
  0x21   :  { %s108_s6 = vpop.sfrf %107 }
  0x22   :  { %p143_p3 = scmp.ne.s32.totalorder %s108_s6, 0 }
  0x24   :  { %112 = shalt.err (%p143_p3)  }

</bundles_post_ra>
